<compile_context>
chip_gen: v5e
topology: v5e:2x2
jax: 0.10.0
libtpu: 0.0.40
codegen_flags: <defaults>
</compile_context>

<pallas_src>
import functools

import jax
import jax.numpy as jnp
from jax import lax
from jax.experimental import pallas as pl
from jax.experimental.pallas import tpu as pltpu


def _round_up8(c):
    return max(8, ((c + 7) // 8) * 8)


def d_conv_kernel(x_ref, m_ref, w1_ref, b1_ref, w2_ref, b2_ref, o_ref, *, W):
    """Fused (Conv3x3 + folded BN + ReLU) x 2 for one batch element, CHW-flat layout.

    x_ref : (1, Cin, HW)   f32 input, H*W lane-dense
    m_ref : (9, HW)        f32 0/1 border masks, one row per 3x3 tap
    w1_ref: (Cm8, 9*Ci8)   bf16 folded weights (columns tap-major, channel-minor)
    b1_ref: (Cm8, 1)       f32 folded shift (conv bias + BN)
    w2_ref: (Co8, 9*Cm8)   bf16 folded weights
    b2_ref: (Co8, 1)       f32 folded shift
    o_ref : (1, Cout, HW)  lane-dense output, already NCHW-ordered
    """
    cin = x_ref.shape[1]
    hw = x_ref.shape[2]
    ci8 = w1_ref.shape[1] // 9
    cout = o_ref.shape[1]

    x = x_ref[0].astype(jnp.float32)                       # (Cin, HW)
    if ci8 > cin:                                          # sublane-align the tap pieces
        x = jnp.concatenate(
            [x, jnp.zeros((ci8 - cin, hw), jnp.float32)], axis=0)

    def conv_bn_relu(a, w_ref, b_ref):
        # Patch assembly: each tap is a small lane roll of the lane-dense activation,
        # zeroed outside the image by the precomputed masks; the 9 pieces (8 sublanes
        # each after channel padding) are stacked on the sublane axis -> aligned concat.
        # (jnp.roll = two static lane slices + concat; pltpu.roll is a drop-in upgrade.)
        pieces = []
        for kh in range(3):
            for kw in range(3):
                delta = (kh - 1) * W + (kw - 1)
                if delta == 0:
                    pieces.append(a)                       # centre tap: mask is all-ones
                else:
                    t = kh * 3 + kw
                    pieces.append(jnp.roll(a, -delta, axis=1) * m_ref[t:t + 1, :])
        patches = jnp.concatenate(pieces, axis=0).astype(jnp.bfloat16)   # (9*C8, HW)
        y = jnp.dot(w_ref[...], patches,
                    preferred_element_type=jnp.float32)    # (C8_out, HW), f32 acc
        return jnp.maximum(y + b_ref[...], 0.0)            # f32 bias + ReLU epilogue

    y1 = conv_bn_relu(x, w1_ref, b1_ref)                   # (Cm8, HW); padded rows == 0
    y2 = conv_bn_relu(y1, w2_ref, b2_ref)                  # (Co8, HW)
    o_ref[0] = y2[:cout, :].astype(o_ref.dtype)


def fold_conv_bn(w_oihw, conv_b, gamma, beta, rmean, rvar, cin_pad, cout_pad, eps=1e-5):
    """Fold inference BN into the conv and pad channels to multiples of 8.

    Returns a (cout_pad, 9*cin_pad) bf16 weight matrix whose columns are ordered
    tap-major / channel-minor (matching the kernel's patch-row order) and a
    (cout_pad, 1) f32 shift.  Folding happens in f32; only the product is cast to bf16.
    """
    cout, cin = w_oihw.shape[0], w_oihw.shape[1]
    scale = gamma / jnp.sqrt(rvar + eps)                                      # (cout,)
    w = jnp.transpose(w_oihw, (0, 2, 3, 1)) * scale[:, None, None, None]      # (cout,3,3,cin)
    w = jnp.pad(w, ((0, cout_pad - cout), (0, 0), (0, 0), (0, cin_pad - cin)))
    w = w.reshape(cout_pad, 9 * cin_pad).astype(jnp.bfloat16)
    shift = (conv_b - rmean) * scale + beta
    shift = jnp.pad(shift, (0, cout_pad - cout)).astype(jnp.float32)
    return w, shift.reshape(cout_pad, 1)


def make_tap_masks(H, W):
    """(9, H*W) f32 0/1 masks: mask[kh*3+kw, p] = 1 iff tap (kh, kw) of output pixel p
    reads inside the image (implements the conv's zero padding without a padded buffer)."""
    h = jnp.arange(H)[:, None]
    w = jnp.arange(W)[None, :]
    rows = []
    for kh in range(3):
        for kw in range(3):
            ok = ((h + kh - 1 >= 0) & (h + kh - 1 < H) &
                  (w + kw - 1 >= 0) & (w + kw - 1 < W))
            rows.append(ok.astype(jnp.float32).reshape(H * W))
    return jnp.stack(rows, axis=0)


@jax.jit
def d_conv_layer(x_nchw, p1, p2):
    """Forward pass of D_ConvLayer. x_nchw: (N, Cin, H, W) -> (N, Cout, H, W)."""
    N, Cin, H, W = x_nchw.shape
    Cmid = p1["w_oihw"].shape[0]
    Cout = p2["w_oihw"].shape[0]
    Ci8, Cm8, Co8 = _round_up8(Cin), _round_up8(Cmid), _round_up8(Cout)
    HW = H * W

    w1, b1 = fold_conv_bn(p1["w_oihw"], p1["conv_b"], p1["gamma"], p1["beta"],
                          p1["rmean"], p1["rvar"], Ci8, Cm8)
    w2, b2 = fold_conv_bn(p2["w_oihw"], p2["conv_b"], p2["gamma"], p2["beta"],
                          p2["rmean"], p2["rvar"], Cm8, Co8)
    masks = make_tap_masks(H, W)

    # CHW-flat layout: contiguous reshape only — no host-side transpose or pad.
    x_flat = x_nchw.reshape(N, Cin, HW)

    out = pl.pallas_call(
        functools.partial(d_conv_kernel, W=W),
        out_shape=jax.ShapeDtypeStruct((N, Cout, HW), x_nchw.dtype),
        grid_spec=pltpu.PrefetchScalarGridSpec(
            num_scalar_prefetch=0,
            grid=(N,),
            in_specs=[
                pl.BlockSpec((1, Cin, HW), lambda n: (n, 0, 0)),
                pl.BlockSpec((9, HW), lambda n: (0, 0)),
                pl.BlockSpec((Cm8, 9 * Ci8), lambda n: (0, 0)),
                pl.BlockSpec((Cm8, 1), lambda n: (0, 0)),
                pl.BlockSpec((Co8, 9 * Cm8), lambda n: (0, 0)),
                pl.BlockSpec((Co8, 1), lambda n: (0, 0)),
            ],
            out_specs=pl.BlockSpec((1, Cout, HW), lambda n: (n, 0, 0)),
        ),
        compiler_params=pltpu.CompilerParams(dimension_semantics=("parallel",)),
    )(x_flat, masks, w1, b1, w2, b2)

    return out.reshape(N, Cout, H, W)


def make_stage_params(key, cin, cout):
    """Deterministic synthetic params for Conv2d(cin, cout, 3) + BatchNorm2d(cout)."""
    ks = jax.random.split(key, 6)
    w_oihw = 0.1 * jax.random.normal(ks[0], (cout, cin, 3, 3), jnp.float32)
    conv_b = 0.1 * jax.random.normal(ks[1], (cout,), jnp.float32)
    gamma = 1.0 + 0.1 * jax.random.normal(ks[2], (cout,), jnp.float32)
    beta = 0.1 * jax.random.normal(ks[3], (cout,), jnp.float32)
    rmean = 0.1 * jax.random.normal(ks[4], (cout,), jnp.float32)
    rvar = 0.5 + jnp.abs(jax.random.normal(ks[5], (cout,), jnp.float32))
    return dict(w_oihw=w_oihw, conv_b=conv_b, gamma=gamma, beta=beta,
                rmean=rmean, rvar=rvar)


def reference_d_conv_layer(x_nchw, p1, p2):
    """Pure-JAX (XLA conv, f32) reference for correctness checking."""
    def stage(x, p):
        y = lax.conv_general_dilated(
            x, p["w_oihw"], window_strides=(1, 1), padding=((1, 1), (1, 1)),
            dimension_numbers=("NCHW", "OIHW", "NCHW"))
        y = y + p["conv_b"][None, :, None, None]
        scale = p["gamma"] / jnp.sqrt(p["rvar"] + 1e-5)
        y = (y - p["rmean"][None, :, None, None]) * scale[None, :, None, None] \
            + p["beta"][None, :, None, None]
        return jnp.maximum(y, 0.0)
    return stage(stage(x_nchw, p1), p2)


if __name__ == "__main__":
    in_ch, out_ch = 4, 8
    N, H, W = 2, 16, 16

    key = jax.random.PRNGKey(0)
    kx, k1, k2 = jax.random.split(key, 3)
    x = jax.random.normal(kx, (N, in_ch, H, W), jnp.float32)

    p1 = make_stage_params(k1, in_ch, in_ch)    # Conv2d(in_ch, in_ch, 3) + BN(in_ch)
    p2 = make_stage_params(k2, in_ch, out_ch)   # Conv2d(in_ch, out_ch, 3) + BN(out_ch)

    out = jax.block_until_ready(d_conv_layer(x, p1, p2))
    ref = jax.block_until_ready(reference_d_conv_layer(x, p1, p2))

    assert out.shape == (N, out_ch, H, W), out.shape
    max_err = float(jnp.max(jnp.abs(out - ref)))
    # bf16 matmul operands (f32 accumulate) vs an all-f32 XLA reference.
    assert jnp.allclose(out, ref, atol=2e-2, rtol=2e-2), max_err

    print("KERNEL_OK")
</pallas_src>

<mosaic_0001>
module attributes {stable_mosaic.version = 11 : i64} {
  func.func @d_conv_kernel(%arg0: i32, %arg1: memref<1x4x256xf32, #tpu.memory_space<vmem>>, %arg2: memref<9x256xf32, #tpu.memory_space<vmem>>, %arg3: memref<8x72xbf16, #tpu.memory_space<vmem>>, %arg4: memref<8x1xf32, #tpu.memory_space<vmem>>, %arg5: memref<8x72xbf16, #tpu.memory_space<vmem>>, %arg6: memref<8x1xf32, #tpu.memory_space<vmem>>, %arg7: memref<1x8x256xf32, #tpu.memory_space<vmem>>) attributes {dimension_semantics = [#tpu.dimension_semantics<parallel>], iteration_bounds = array<i64: 2>, scalar_prefetch = 0 : i64, scratch_operands = 0 : i64, tpu.core_type = #tpu.core_type<tc>, window_params = [{transform_indices = @transform_0, window_bounds = array<i64: 1, 4, 256>}, {pipeline_mode = #tpu.pipeline_mode<synchronous>, transform_indices = @transform_1, window_bounds = array<i64: 9, 256>}, {pipeline_mode = #tpu.pipeline_mode<synchronous>, transform_indices = @transform_2, window_bounds = array<i64: 8, 72>}, {pipeline_mode = #tpu.pipeline_mode<synchronous>, transform_indices = @transform_3, window_bounds = array<i64: 8, 1>}, {pipeline_mode = #tpu.pipeline_mode<synchronous>, transform_indices = @transform_4, window_bounds = array<i64: 8, 72>}, {pipeline_mode = #tpu.pipeline_mode<synchronous>, transform_indices = @transform_5, window_bounds = array<i64: 8, 1>}, {transform_indices = @transform_6, window_bounds = array<i64: 1, 8, 256>}]} {
    %c0 = arith.constant 0 : index
    %c0_0 = arith.constant 0 : index
    %c0_1 = arith.constant 0 : index
    %0 = vector.load %arg1[%c0, %c0_0, %c0_1] : memref<1x4x256xf32, #tpu.memory_space<vmem>>, vector<1x4x256xf32>
    %1 = vector.shape_cast %0 : vector<1x4x256xf32> to vector<4x256xf32>
    %cst = arith.constant 0.000000e+00 : f32
    %2 = vector.broadcast %cst : f32 to vector<4x256xf32>
    %3 = tpu.concatenate %1, %2 in 0 : vector<4x256xf32>, vector<4x256xf32> -> vector<8x256xf32>
    %4 = vector.extract_strided_slice %3 {offsets = [0, 239], sizes = [8, 17], strides = [1, 1]} : vector<8x256xf32> to vector<8x17xf32>
    %5 = vector.extract_strided_slice %3 {offsets = [0, 0], sizes = [8, 239], strides = [1, 1]} : vector<8x256xf32> to vector<8x239xf32>
    %6 = tpu.concatenate %4, %5 in 1 : vector<8x17xf32>, vector<8x239xf32> -> vector<8x256xf32>
    %c0_2 = arith.constant 0 : index
    %c0_3 = arith.constant 0 : index
    %7 = vector.load %arg2[%c0_2, %c0_3] : memref<9x256xf32, #tpu.memory_space<vmem>>, vector<1x256xf32>
    %8 = vector.broadcast %7 : vector<1x256xf32> to vector<8x256xf32>
    %9 = arith.mulf %6, %8 : vector<8x256xf32>
    %10 = vector.extract_strided_slice %3 {offsets = [0, 240], sizes = [8, 16], strides = [1, 1]} : vector<8x256xf32> to vector<8x16xf32>
    %11 = vector.extract_strided_slice %3 {offsets = [0, 0], sizes = [8, 240], strides = [1, 1]} : vector<8x256xf32> to vector<8x240xf32>
    %12 = tpu.concatenate %10, %11 in 1 : vector<8x16xf32>, vector<8x240xf32> -> vector<8x256xf32>
    %c1 = arith.constant 1 : index
    %c0_4 = arith.constant 0 : index
    %13 = vector.load %arg2[%c1, %c0_4] : memref<9x256xf32, #tpu.memory_space<vmem>>, vector<1x256xf32>
    %14 = vector.broadcast %13 : vector<1x256xf32> to vector<8x256xf32>
    %15 = arith.mulf %12, %14 : vector<8x256xf32>
    %16 = vector.extract_strided_slice %3 {offsets = [0, 241], sizes = [8, 15], strides = [1, 1]} : vector<8x256xf32> to vector<8x15xf32>
    %17 = vector.extract_strided_slice %3 {offsets = [0, 0], sizes = [8, 241], strides = [1, 1]} : vector<8x256xf32> to vector<8x241xf32>
    %18 = tpu.concatenate %16, %17 in 1 : vector<8x15xf32>, vector<8x241xf32> -> vector<8x256xf32>
    %c2 = arith.constant 2 : index
    %c0_5 = arith.constant 0 : index
    %19 = vector.load %arg2[%c2, %c0_5] : memref<9x256xf32, #tpu.memory_space<vmem>>, vector<1x256xf32>
    %20 = vector.broadcast %19 : vector<1x256xf32> to vector<8x256xf32>
    %21 = arith.mulf %18, %20 : vector<8x256xf32>
    %22 = vector.extract_strided_slice %3 {offsets = [0, 255], sizes = [8, 1], strides = [1, 1]} : vector<8x256xf32> to vector<8x1xf32>
    %23 = vector.extract_strided_slice %3 {offsets = [0, 0], sizes = [8, 255], strides = [1, 1]} : vector<8x256xf32> to vector<8x255xf32>
    %24 = tpu.concatenate %22, %23 in 1 : vector<8x1xf32>, vector<8x255xf32> -> vector<8x256xf32>
    %c3 = arith.constant 3 : index
    %c0_6 = arith.constant 0 : index
    %25 = vector.load %arg2[%c3, %c0_6] : memref<9x256xf32, #tpu.memory_space<vmem>>, vector<1x256xf32>
    %26 = vector.broadcast %25 : vector<1x256xf32> to vector<8x256xf32>
    %27 = arith.mulf %24, %26 : vector<8x256xf32>
    %28 = vector.extract_strided_slice %3 {offsets = [0, 1], sizes = [8, 255], strides = [1, 1]} : vector<8x256xf32> to vector<8x255xf32>
    %29 = vector.extract_strided_slice %3 {offsets = [0, 0], sizes = [8, 1], strides = [1, 1]} : vector<8x256xf32> to vector<8x1xf32>
    %30 = tpu.concatenate %28, %29 in 1 : vector<8x255xf32>, vector<8x1xf32> -> vector<8x256xf32>
    %c5 = arith.constant 5 : index
    %c0_7 = arith.constant 0 : index
    %31 = vector.load %arg2[%c5, %c0_7] : memref<9x256xf32, #tpu.memory_space<vmem>>, vector<1x256xf32>
    %32 = vector.broadcast %31 : vector<1x256xf32> to vector<8x256xf32>
    %33 = arith.mulf %30, %32 : vector<8x256xf32>
    %34 = vector.extract_strided_slice %3 {offsets = [0, 15], sizes = [8, 241], strides = [1, 1]} : vector<8x256xf32> to vector<8x241xf32>
    %35 = vector.extract_strided_slice %3 {offsets = [0, 0], sizes = [8, 15], strides = [1, 1]} : vector<8x256xf32> to vector<8x15xf32>
    %36 = tpu.concatenate %34, %35 in 1 : vector<8x241xf32>, vector<8x15xf32> -> vector<8x256xf32>
    %c6 = arith.constant 6 : index
    %c0_8 = arith.constant 0 : index
    %37 = vector.load %arg2[%c6, %c0_8] : memref<9x256xf32, #tpu.memory_space<vmem>>, vector<1x256xf32>
    %38 = vector.broadcast %37 : vector<1x256xf32> to vector<8x256xf32>
    %39 = arith.mulf %36, %38 : vector<8x256xf32>
    %40 = vector.extract_strided_slice %3 {offsets = [0, 16], sizes = [8, 240], strides = [1, 1]} : vector<8x256xf32> to vector<8x240xf32>
    %41 = vector.extract_strided_slice %3 {offsets = [0, 0], sizes = [8, 16], strides = [1, 1]} : vector<8x256xf32> to vector<8x16xf32>
    %42 = tpu.concatenate %40, %41 in 1 : vector<8x240xf32>, vector<8x16xf32> -> vector<8x256xf32>
    %c7 = arith.constant 7 : index
    %c0_9 = arith.constant 0 : index
    %43 = vector.load %arg2[%c7, %c0_9] : memref<9x256xf32, #tpu.memory_space<vmem>>, vector<1x256xf32>
    %44 = vector.broadcast %43 : vector<1x256xf32> to vector<8x256xf32>
    %45 = arith.mulf %42, %44 : vector<8x256xf32>
    %46 = vector.extract_strided_slice %3 {offsets = [0, 17], sizes = [8, 239], strides = [1, 1]} : vector<8x256xf32> to vector<8x239xf32>
    %47 = vector.extract_strided_slice %3 {offsets = [0, 0], sizes = [8, 17], strides = [1, 1]} : vector<8x256xf32> to vector<8x17xf32>
    %48 = tpu.concatenate %46, %47 in 1 : vector<8x239xf32>, vector<8x17xf32> -> vector<8x256xf32>
    %c8 = arith.constant 8 : index
    %c0_10 = arith.constant 0 : index
    %49 = vector.load %arg2[%c8, %c0_10] : memref<9x256xf32, #tpu.memory_space<vmem>>, vector<1x256xf32>
    %50 = vector.broadcast %49 : vector<1x256xf32> to vector<8x256xf32>
    %51 = arith.mulf %48, %50 : vector<8x256xf32>
    %52 = tpu.concatenate %9, %15, %21, %27, %3, %33, %39, %45, %51 in 0 : vector<8x256xf32>, vector<8x256xf32>, vector<8x256xf32>, vector<8x256xf32>, vector<8x256xf32>, vector<8x256xf32>, vector<8x256xf32>, vector<8x256xf32>, vector<8x256xf32> -> vector<72x256xf32>
    %53 = arith.truncf %52 : vector<72x256xf32> to vector<72x256xbf16>
    %c0_11 = arith.constant 0 : index
    %c0_12 = arith.constant 0 : index
    %54 = vector.load %arg3[%c0_11, %c0_12] : memref<8x72xbf16, #tpu.memory_space<vmem>>, vector<8x72xbf16>
    %cst_13 = arith.constant dense<0.000000e+00> : vector<8x256xf32>
    %55 = tpu.matmul %54, %53, %cst_13 {dimension_numbers = #tpu.dot_dimension_numbers<[1], [0], [0], [1], [0, 0, 1, 1], [], []>} : vector<8x72xbf16>, vector<72x256xbf16>, vector<8x256xf32> -> vector<8x256xf32>
    %c0_14 = arith.constant 0 : index
    %c0_15 = arith.constant 0 : index
    %56 = vector.load %arg4[%c0_14, %c0_15] : memref<8x1xf32, #tpu.memory_space<vmem>>, vector<8x1xf32>
    %57 = vector.broadcast %56 : vector<8x1xf32> to vector<8x256xf32>
    %58 = arith.addf %55, %57 : vector<8x256xf32>
    %cst_16 = arith.constant 0.000000e+00 : f32
    %59 = vector.broadcast %cst_16 : f32 to vector<8x256xf32>
    %60 = arith.maximumf %58, %59 : vector<8x256xf32>
    %61 = vector.extract_strided_slice %60 {offsets = [0, 239], sizes = [8, 17], strides = [1, 1]} : vector<8x256xf32> to vector<8x17xf32>
    %62 = vector.extract_strided_slice %60 {offsets = [0, 0], sizes = [8, 239], strides = [1, 1]} : vector<8x256xf32> to vector<8x239xf32>
    %63 = tpu.concatenate %61, %62 in 1 : vector<8x17xf32>, vector<8x239xf32> -> vector<8x256xf32>
    %c0_17 = arith.constant 0 : index
    %c0_18 = arith.constant 0 : index
    %64 = vector.load %arg2[%c0_17, %c0_18] : memref<9x256xf32, #tpu.memory_space<vmem>>, vector<1x256xf32>
    %65 = vector.broadcast %64 : vector<1x256xf32> to vector<8x256xf32>
    %66 = arith.mulf %63, %65 : vector<8x256xf32>
    %67 = vector.extract_strided_slice %60 {offsets = [0, 240], sizes = [8, 16], strides = [1, 1]} : vector<8x256xf32> to vector<8x16xf32>
    %68 = vector.extract_strided_slice %60 {offsets = [0, 0], sizes = [8, 240], strides = [1, 1]} : vector<8x256xf32> to vector<8x240xf32>
    %69 = tpu.concatenate %67, %68 in 1 : vector<8x16xf32>, vector<8x240xf32> -> vector<8x256xf32>
    %c1_19 = arith.constant 1 : index
    %c0_20 = arith.constant 0 : index
    %70 = vector.load %arg2[%c1_19, %c0_20] : memref<9x256xf32, #tpu.memory_space<vmem>>, vector<1x256xf32>
    %71 = vector.broadcast %70 : vector<1x256xf32> to vector<8x256xf32>
    %72 = arith.mulf %69, %71 : vector<8x256xf32>
    %73 = vector.extract_strided_slice %60 {offsets = [0, 241], sizes = [8, 15], strides = [1, 1]} : vector<8x256xf32> to vector<8x15xf32>
    %74 = vector.extract_strided_slice %60 {offsets = [0, 0], sizes = [8, 241], strides = [1, 1]} : vector<8x256xf32> to vector<8x241xf32>
    %75 = tpu.concatenate %73, %74 in 1 : vector<8x15xf32>, vector<8x241xf32> -> vector<8x256xf32>
    %c2_21 = arith.constant 2 : index
    %c0_22 = arith.constant 0 : index
    %76 = vector.load %arg2[%c2_21, %c0_22] : memref<9x256xf32, #tpu.memory_space<vmem>>, vector<1x256xf32>
    %77 = vector.broadcast %76 : vector<1x256xf32> to vector<8x256xf32>
    %78 = arith.mulf %75, %77 : vector<8x256xf32>
    %79 = vector.extract_strided_slice %60 {offsets = [0, 255], sizes = [8, 1], strides = [1, 1]} : vector<8x256xf32> to vector<8x1xf32>
    %80 = vector.extract_strided_slice %60 {offsets = [0, 0], sizes = [8, 255], strides = [1, 1]} : vector<8x256xf32> to vector<8x255xf32>
    %81 = tpu.concatenate %79, %80 in 1 : vector<8x1xf32>, vector<8x255xf32> -> vector<8x256xf32>
    %c3_23 = arith.constant 3 : index
    %c0_24 = arith.constant 0 : index
    %82 = vector.load %arg2[%c3_23, %c0_24] : memref<9x256xf32, #tpu.memory_space<vmem>>, vector<1x256xf32>
    %83 = vector.broadcast %82 : vector<1x256xf32> to vector<8x256xf32>
    %84 = arith.mulf %81, %83 : vector<8x256xf32>
    %85 = vector.extract_strided_slice %60 {offsets = [0, 1], sizes = [8, 255], strides = [1, 1]} : vector<8x256xf32> to vector<8x255xf32>
    %86 = vector.extract_strided_slice %60 {offsets = [0, 0], sizes = [8, 1], strides = [1, 1]} : vector<8x256xf32> to vector<8x1xf32>
    %87 = tpu.concatenate %85, %86 in 1 : vector<8x255xf32>, vector<8x1xf32> -> vector<8x256xf32>
    %c5_25 = arith.constant 5 : index
    %c0_26 = arith.constant 0 : index
    %88 = vector.load %arg2[%c5_25, %c0_26] : memref<9x256xf32, #tpu.memory_space<vmem>>, vector<1x256xf32>
    %89 = vector.broadcast %88 : vector<1x256xf32> to vector<8x256xf32>
    %90 = arith.mulf %87, %89 : vector<8x256xf32>
    %91 = vector.extract_strided_slice %60 {offsets = [0, 15], sizes = [8, 241], strides = [1, 1]} : vector<8x256xf32> to vector<8x241xf32>
    %92 = vector.extract_strided_slice %60 {offsets = [0, 0], sizes = [8, 15], strides = [1, 1]} : vector<8x256xf32> to vector<8x15xf32>
    %93 = tpu.concatenate %91, %92 in 1 : vector<8x241xf32>, vector<8x15xf32> -> vector<8x256xf32>
    %c6_27 = arith.constant 6 : index
    %c0_28 = arith.constant 0 : index
    %94 = vector.load %arg2[%c6_27, %c0_28] : memref<9x256xf32, #tpu.memory_space<vmem>>, vector<1x256xf32>
    %95 = vector.broadcast %94 : vector<1x256xf32> to vector<8x256xf32>
    %96 = arith.mulf %93, %95 : vector<8x256xf32>
    %97 = vector.extract_strided_slice %60 {offsets = [0, 16], sizes = [8, 240], strides = [1, 1]} : vector<8x256xf32> to vector<8x240xf32>
    %98 = vector.extract_strided_slice %60 {offsets = [0, 0], sizes = [8, 16], strides = [1, 1]} : vector<8x256xf32> to vector<8x16xf32>
    %99 = tpu.concatenate %97, %98 in 1 : vector<8x240xf32>, vector<8x16xf32> -> vector<8x256xf32>
    %c7_29 = arith.constant 7 : index
    %c0_30 = arith.constant 0 : index
    %100 = vector.load %arg2[%c7_29, %c0_30] : memref<9x256xf32, #tpu.memory_space<vmem>>, vector<1x256xf32>
    %101 = vector.broadcast %100 : vector<1x256xf32> to vector<8x256xf32>
    %102 = arith.mulf %99, %101 : vector<8x256xf32>
    %103 = vector.extract_strided_slice %60 {offsets = [0, 17], sizes = [8, 239], strides = [1, 1]} : vector<8x256xf32> to vector<8x239xf32>
    %104 = vector.extract_strided_slice %60 {offsets = [0, 0], sizes = [8, 17], strides = [1, 1]} : vector<8x256xf32> to vector<8x17xf32>
    %105 = tpu.concatenate %103, %104 in 1 : vector<8x239xf32>, vector<8x17xf32> -> vector<8x256xf32>
    %c8_31 = arith.constant 8 : index
    %c0_32 = arith.constant 0 : index
    %106 = vector.load %arg2[%c8_31, %c0_32] : memref<9x256xf32, #tpu.memory_space<vmem>>, vector<1x256xf32>
    %107 = vector.broadcast %106 : vector<1x256xf32> to vector<8x256xf32>
    %108 = arith.mulf %105, %107 : vector<8x256xf32>
    %109 = tpu.concatenate %66, %72, %78, %84, %60, %90, %96, %102, %108 in 0 : vector<8x256xf32>, vector<8x256xf32>, vector<8x256xf32>, vector<8x256xf32>, vector<8x256xf32>, vector<8x256xf32>, vector<8x256xf32>, vector<8x256xf32>, vector<8x256xf32> -> vector<72x256xf32>
    %110 = arith.truncf %109 : vector<72x256xf32> to vector<72x256xbf16>
    %c0_33 = arith.constant 0 : index
    %c0_34 = arith.constant 0 : index
    %111 = vector.load %arg5[%c0_33, %c0_34] : memref<8x72xbf16, #tpu.memory_space<vmem>>, vector<8x72xbf16>
    %cst_35 = arith.constant dense<0.000000e+00> : vector<8x256xf32>
    %112 = tpu.matmul %111, %110, %cst_35 {dimension_numbers = #tpu.dot_dimension_numbers<[1], [0], [0], [1], [0, 0, 1, 1], [], []>} : vector<8x72xbf16>, vector<72x256xbf16>, vector<8x256xf32> -> vector<8x256xf32>
    %c0_36 = arith.constant 0 : index
    %c0_37 = arith.constant 0 : index
    %113 = vector.load %arg6[%c0_36, %c0_37] : memref<8x1xf32, #tpu.memory_space<vmem>>, vector<8x1xf32>
    %114 = vector.broadcast %113 : vector<8x1xf32> to vector<8x256xf32>
    %115 = arith.addf %112, %114 : vector<8x256xf32>
    %cst_38 = arith.constant 0.000000e+00 : f32
    %116 = vector.broadcast %cst_38 : f32 to vector<8x256xf32>
    %117 = arith.maximumf %115, %116 : vector<8x256xf32>
    %c0_39 = arith.constant 0 : index
    %c0_40 = arith.constant 0 : index
    %c0_41 = arith.constant 0 : index
    %118 = vector.load %arg7[%c0_39, %c0_40, %c0_41] : memref<1x8x256xf32, #tpu.memory_space<vmem>>, vector<1x8x256xf32>
    %119 = vector.shape_cast %118 : vector<1x8x256xf32> to vector<8x256xf32>
    %120 = vector.shape_cast %117 : vector<8x256xf32> to vector<1x8x256xf32>
    tpu.vector_store %arg7[%c0_39, %c0_40, %c0_41], %120 {strides = array<i32>} : memref<1x8x256xf32, #tpu.memory_space<vmem>>, vector<1x8x256xf32>,
    return
  }
  func.func @transform_0(%arg0: i32) -> (i32, i32, i32) {
    %c0_i32 = arith.constant 0 : i32
    %c0_i32_0 = arith.constant 0 : i32
    %c0_i32_1 = arith.constant 0 : i32
    return %arg0, %c0_i32, %c0_i32_0 : i32, i32, i32
  }
  func.func @transform_1(%arg0: i32) -> (i32, i32) {
    %c0_i32 = arith.constant 0 : i32
    %c0_i32_0 = arith.constant 0 : i32
    %c0_i32_1 = arith.constant 0 : i32
    return %c0_i32, %c0_i32_0 : i32, i32
  }
  func.func @transform_2(%arg0: i32) -> (i32, i32) {
    %c0_i32 = arith.constant 0 : i32
    %c0_i32_0 = arith.constant 0 : i32
    %c0_i32_1 = arith.constant 0 : i32
    return %c0_i32, %c0_i32_0 : i32, i32
  }
  func.func @transform_3(%arg0: i32) -> (i32, i32) {
    %c0_i32 = arith.constant 0 : i32
    %c0_i32_0 = arith.constant 0 : i32
    %c0_i32_1 = arith.constant 0 : i32
    return %c0_i32, %c0_i32_0 : i32, i32
  }
  func.func @transform_4(%arg0: i32) -> (i32, i32) {
    %c0_i32 = arith.constant 0 : i32
    %c0_i32_0 = arith.constant 0 : i32
    %c0_i32_1 = arith.constant 0 : i32
    return %c0_i32, %c0_i32_0 : i32, i32
  }
  func.func @transform_5(%arg0: i32) -> (i32, i32) {
    %c0_i32 = arith.constant 0 : i32
    %c0_i32_0 = arith.constant 0 : i32
    %c0_i32_1 = arith.constant 0 : i32
    return %c0_i32, %c0_i32_0 : i32, i32
  }
  func.func @transform_6(%arg0: i32) -> (i32, i32, i32) {
    %c0_i32 = arith.constant 0 : i32
    %c0_i32_0 = arith.constant 0 : i32
    %c0_i32_1 = arith.constant 0 : i32
    return %arg0, %c0_i32, %c0_i32_0 : i32, i32, i32
  }
}

</mosaic_0001>

<bundles_post_ra>
// kernel: d_conv_layer.1
= control target key start
LH: loop header
LB: loop body
LE: loop exit
PB: predicated region body
PF: predicated region fallthrough
CT: control target
= control target key end

     0   :  { %s775_s21 = smov 0   ;;  %s1011_s0 = inlined_call_operand.vmem [shape: f32[2,4,256], index: 0, kind: input, shape index: {}]   ;;  %s1012_s1 = inlined_call_operand.vmem [shape: f32[9,256], index: 1, kind: input, shape index: {}]   ;;  %s1013_s2 = inlined_call_operand.vmem [shape: bf16[8,72], index: 2, kind: input, shape index: {}]   ;;  %s1014_s3 = inlined_call_operand.vmem [shape: f32[8,1], index: 3, kind: input, shape index: {}]   ;;  %s1015_s4 = inlined_call_operand.vmem [shape: bf16[8,72], index: 4, kind: input, shape index: {}]   ;;  %s1016_s5 = inlined_call_operand.vmem [shape: f32[8,1], index: 5, kind: input, shape index: {}]   ;;  %s1017_s6 = inlined_call_operand.vmem [shape: f32[2,8,256], index: 6, kind: output, shape index: {}]  }
   0x1 LB: > { %s672_s22 = sadd.s32 4294967295, %s728_s21   ;;  %p676_p0 = scmp.ge.s32.totalorder %s728_s21, 1  ;;  %s728_s21 = sphi %s775_s21, %s16_s21  }
   0x2   : > { %p212_p1 = scmp.lt.s32.totalorder %s728_s21, 3 }
   0x4   : > { %p213_p2 = pnand %p676_p0, %p212_p1 }
   0x5   : > { %p242_p3 = scmp.lt.s32.totalorder (!%p213_p2), %s672_s22, 1  ;;  %s730_s27 = smov (!%p213_p2), 113  }
   0x6   : > { %216 = sbr.rel (%p213_p2) target bundleno = 613 (0x265), region = 44  ;;  %s731_s28 = smov (!%p213_p2), 111  }
   0x7   : > { %s732_s29 = smov (!%p213_p2), 112   ;;  %s733_s30 = smov (!%p213_p2), 127  }
   0x8   : > { %s734_s7 = smov (!%p213_p2), 15   ;;  %s735_s8 = smov (!%p213_p2), 1  }
   0x9   : > { %s736_s9 = smov (!%p213_p2), 17   ;;  %s737_s10 = smov (!%p213_p2), 16  }
   0xb   : > { %s1019_s22 = smov (!%p242_p3, %s672_s22), 1  ;;  %vm260_vm0 = vcmask 1043456   ;;  %v816_v9 = vld [vmem:[%s1012_s1 + $0x10] ss:$8 sm:$0x3]  ;;  %vm382_vm1 = vcmask 916480  }
   0xc   : > { %s700_s23 = sshll.u32 %s1019_s22, 3  ;;  %v821_v10 = vld [vmem:[%s1012_s1 + $0x7] ss:$8 sm:$0x3]  ;;  %vm363_vm2 = vcmask 924672   ;;  %vm401_vm3 = vcmask 908288  }
   0xd   : > { %s246_s26 = scalar_lea.vmem %s1011_s0, %s700_s23  ;;  %v826_v11 = vld [vmem:[%s1012_s1 + $0x6] ss:$8 sm:$0x3]  ;;  %v410_v12 = vperm.slane %v816_v9, 0  ;;  %v411_v13 = vperm.slane %v816_v9, 1  ;;  %v391_v14 = vperm.slane %v821_v10, 0 }
   0xe   : > { %v253_v0 = vld [vmem:[%s246_s26] sm:$0xff]  ;;  %v392_v15 = vperm.slane %v821_v10, 1  ;;  %v372_v16 = vperm.slane %v826_v11, 0  ;;  %v373_v17 = vperm.slane %v826_v11, 1  ;;  %vm344_vm4 = vcmask 1039360  }
   0xf   : > { %255 = vst [vmem:[#allocation1] ss:$2 sm:$0xff] %v253_v0  ;;  %v847_v28 = vld [vmem:[%s1012_s1 + $0x5] ss:$8 sm:$0x3]  ;;  %v738_v50 = vmov 0  }
  0x10   : > { %v353_v38 = vperm.slane %v847_v28, 0  ;;  %v354_v39 = vperm.slane %v847_v28, 1  ;;  %v427_v46 = vld [vmem:[%s1014_s3] sm:$0xff]  ;;  %720 = vset.pattern.permute.xlu1 %v738_v50  ;;  %721 = vset.pattern.permute.xlu0 %v738_v50  ;;  %vm739_vm5 = vmmov 1   ;;  %vm326_vm7 = vcmask 7168  }
  0x11   : > { %v873_v49 = vld [vmem:[%s1012_s1 + $0x3] ss:$8 sm:$0x3]  ;;  %v878_v51 = vld [vmem:[%s1012_s1 + $0x2] ss:$8 sm:$0x3]  ;;  %vm688_vm6 = vmpackc.low %vm739_vm5, %vm260_vm0 }
  0x12   : > { %v334_v54 = vperm.slane %v873_v49, 0  ;;  %v335_v56 = vperm.slane %v873_v49, 1  ;;  %vm307_vm8 = vcmask 121856   ;;  %v315_v57 = vperm.slane %v878_v51, 0  ;;  %v572_v9 = vld [vmem:[%s1016_s5] sm:$0xff] }
  0x13   : > { %v316_v58 = vperm.slane %v878_v51, 1  ;;  %vm270_vm9 = vcmask 138240   ;;  %vm288_vm10 = vcmask 130048   ;;  %vm433_vm11 = vcmask 588800  }
  0x16   : > { %v789_v1 = vld.sshfl [vmem:[#allocation1] sm:$0xff pattern:$0x75316420]  ;;  %v796_v3 = vld.sshfl [vmem:[#allocation1 + $0x8] sm:$0xff pattern:$0x75316420] }
  0x17   : > { %v261_v2 = vsel %vm260_vm0, %v789_v1, 0.0  ;;  %v262_v4 = vsel %vm260_vm0, %v796_v3, 0.0 }
  0x18   : > { %359 = vrot.lane.b32.xlu1 %v261_v2, %s730_s27  ;;  %397 = vrot.lane.b32.xlu0 %v261_v2, %s731_s28 }
  0x19   : > { %378 = vrot.lane.b32.xlu2 %v261_v2, %s732_s29 }
  0x20   : > { %361 = vrot.lane.b32.xlu1 %v262_v4, %s730_s27  ;;  %399 = vrot.lane.b32.xlu0 %v262_v4, %s731_s28 }
  0x21   : > { %380 = vrot.lane.b32.xlu2 %v262_v4, %s732_s29 }
  0x28   : > { %342 = vrot.lane.b32.xlu1 %v262_v4, %s733_s30  ;;  %340 = vrot.lane.b32.xlu0 %v261_v2, %s733_s30 }
  0x29   : > { %302 = vrot.lane.b32.xlu2 %v262_v4, %s734_s7 }
  0x30   : > { %321 = vrot.lane.b32.xlu1 %v262_v4, %s735_s8  ;;  %305 = vrot.lane.b32.xlu0 %v261_v2, %s734_s7 }
  0x31   : > { %324 = vrot.lane.b32.xlu2 %v261_v2, %s735_s8 }
  0x38   : > { %268 = vrot.lane.b32.xlu1 %v261_v2, %s736_s9  ;;  %264 = vrot.lane.b32.xlu0 %v262_v4, %s736_s9 }
  0x39   : > { %283 = vrot.lane.b32.xlu2 %v262_v4, %s737_s10 }
  0x40   : > { %286 = vrot.lane.b32.xlu0 %v261_v2, %s737_s10  ;;  %430 = vperm.xlu1 %720, %v427_v46  }
  0x73   : > { %v379_v5 = vpop.permute.xlu2 %378 }
  0x7b   : > { %v381_v8 = vpop.permute.xlu2 %380 }
  0x7c   : > { %v383_v20 = vsel %vm382_vm1, %v379_v5, %v381_v8  ;;  %v387_v24 = vsel %vm382_vm1, %v381_v8, %v379_v5  ;;  %v902_v8 = vld [vmem:[%s1012_s1] ss:$8 sm:$0x3] }
  0x7d   : > { %v395_v29 = vmul.f32 %v391_v14, %v383_v20  ;;  %v396_v34 = vmul.f32 %v392_v15, %v387_v24  ;;  %v277_v20 = vperm.slane %v902_v8, 0 }
  0x83   : > { %v303_v33 = vpop.permute.xlu2 %302 }
  0x8a   : > { %v360_v6 = vpop.permute.xlu1 %359  ;;  %v398_v7 = vpop.permute.xlu0 %397 }
  0x8b   : > { %v325_v55 = vpop.permute.xlu2 %324 }
  0x92   : > { %v362_v18 = vpop.permute.xlu1 %361  ;;  %v400_v19 = vpop.permute.xlu0 %399 }
  0x93   : > { %v364_v21 = vsel %vm363_vm2, %v360_v6, %v362_v18  ;;  %v402_v22 = vsel %vm401_vm3, %v398_v7, %v400_v19  ;;  %v406_v23 = vsel %vm401_vm3, %v400_v19, %v398_v7  ;;  %v368_v25 = vsel %vm363_vm2, %v362_v18, %v360_v6  ;;  %v907_v18 = vld [vmem:[%s1012_s1 + $0x1] ss:$8 sm:$0x3] }
  0x94   : > { %v414_v26 = vmul.f32 %v410_v12, %v402_v22  ;;  %v415_v27 = vmul.f32 %v411_v13, %v406_v23  ;;  %v376_v30 = vmul.f32 %v372_v16, %v364_v21  ;;  %v377_v35 = vmul.f32 %v373_v17, %v368_v25  ;;  %v284_v22 = vpop.permute.xlu2 %283 }
  0x95   : > { %v278_v21 = vperm.slane %v902_v8, 1  ;;  %v296_v23 = vperm.slane %v907_v18, 0  ;;  %v297_v24 = vperm.slane %v907_v18, 1 }
  0x96   : > { %v424_v31 = vpack.c.bf16 %v414_v26, %v414_v26  ;;  %v425_v32 = vpack.c.bf16 %v415_v27, %v415_v27  ;;  %v422_v42 = vpack.c.bf16 %v395_v29, %v376_v30  ;;  %v423_v45 = vpack.c.bf16 %v396_v34, %v377_v35 }
  0x98   : > { %v438_v36 = vsel %vm260_vm0, %v424_v31, 0  ;;  %v441_v37 = vsel %vm260_vm0, %v425_v32, 0 }
  0x99   : > { %446 = vmatpush.bf16.msra.mxu0 %v438_v36  ;;  %459 = vmatpush.bf16.msra.mxu1 %v441_v37  ;;  %v426_v37 = vld [vmem:[%s1013_s2] sm:$0xf] }
  0x9a   : > { %v343_v40 = vpop.permute.xlu1 %342  ;;  %v341_v41 = vpop.permute.xlu0 %340 }
  0x9b   : > { %v345_v43 = vsel %vm344_vm4, %v341_v41, %v343_v40  ;;  %v349_v44 = vsel %vm344_vm4, %v343_v40, %v341_v41 }
  0x9c   : > { %v357_v47 = vmul.f32 %v353_v38, %v345_v43  ;;  %v358_v48 = vmul.f32 %v354_v39, %v349_v44 }
  0x9d   : > { %447 = vmatpush.bf16.msra.mxu0 %v422_v42  ;;  %460 = vmatpush.bf16.msra.mxu1 %v423_v45 }
  0x9e   : > { %v689_v52 = vpack.c.bf16 %v357_v47, %v789_v1  ;;  %v693_v53 = vpack.c.bf16 %v358_v48, %v796_v3 }
  0xa1   : > { %690 = vmatpush.bf16.msk.msra.mxu0 %vm688_vm6, %v689_v52  ;;  %694 = vmatpush.bf16.msk.msra.mxu1 %vm688_vm6, %v693_v53 }
  0xa2   : > { %v322_v59 = vpop.permute.xlu1 %321  ;;  %v306_v60 = vpop.permute.xlu0 %305 }
  0xa3   : > { %v327_v61 = vsel %vm326_vm7, %v325_v55, %v322_v59  ;;  %v330_v62 = vsel %vm326_vm7, %v322_v59, %v325_v55  ;;  %v308_v63 = vsel %vm307_vm8, %v306_v60, %v303_v33  ;;  %v311_v0 = vsel %vm307_vm8, %v303_v33, %v306_v60 }
  0xa4   : > { %v338_v1 = vmul.f32 %v334_v54, %v330_v62  ;;  %v339_v2 = vmul.f32 %v335_v56, %v327_v61  ;;  %v319_v3 = vmul.f32 %v315_v57, %v311_v0  ;;  %v320_v4 = vmul.f32 %v316_v58, %v308_v63 }
  0xa6   : > { %v418_v5 = vpack.c.bf16 %v338_v1, %v319_v3  ;;  %v419_v6 = vpack.c.bf16 %v339_v2, %v320_v4 }
  0xa8   : > { %449 = vmatpush.bf16.msra.mxu0 %v418_v5  ;;  %462 = vmatpush.bf16.msra.mxu1 %v419_v6 }
  0xaa   : > { %v265_v7 = vpop.permute.xlu0 %264  ;;  %v269_v19 = vpop.permute.xlu1 %268 }
  0xab   : > { %v271_v25 = vsel %vm270_vm9, %v269_v19, %v265_v7  ;;  %v274_v26 = vsel %vm270_vm9, %v265_v7, %v269_v19 }
  0xac   : > { %v281_v31 = vmul.f32 %v277_v20, %v274_v26  ;;  %v282_v32 = vmul.f32 %v278_v21, %v271_v25 }
  0xb2   : > { %v287_v27 = vpop.permute.xlu0 %286  ;;  %v431_v40 = vpop.permute.xlu1 %430 }
  0xb3   : > { %v289_v29 = vsel %vm288_vm10, %v287_v27, %v284_v22  ;;  %v292_v30 = vsel %vm288_vm10, %v284_v22, %v287_v27 }
  0xb4   : > { %v300_v33 = vmul.f32 %v296_v23, %v292_v30  ;;  %v301_v34 = vmul.f32 %v297_v24, %v289_v29 }
  0xb6   : > { %v416_v35 = vpack.c.bf16 %v300_v33, %v281_v31  ;;  %v417_v36 = vpack.c.bf16 %v301_v34, %v282_v32 }
  0xb8   : > { %450 = vmatpush.bf16.msra.mxu0 %v416_v35  ;;  %463 = vmatpush.bf16.msra.mxu1 %v417_v36 }
  0xbb   : > { %691 = vmatmul.msk.bf16.vlgmr.msra.gmra.mxu0 %vm433_vm11, %v426_v37  ;;  %695 = vmatmul.msk.bf16.vlgmr.msra.gmra.mxu1 %vm433_vm11, %v426_v37 }
 0x138   : > { %v452_v41 = vpop.f32.mrf.mxu0  ;;  %v465_v42 = vpop.f32.mrf.mxu1 }
 0x139   : > { %v453_v43 = vadd.f32 %v452_v41, %v431_v40  ;;  %v466_v44 = vadd.f32 %v465_v42, %v431_v40 }
 0x13b   : > { %v469_v45 = vmax.f32 %v453_v43, 0.0  ;;  %v470_v46 = vmax.f32 %v466_v44, 0.0 }
 0x13d   : > { %528 = vrot.lane.b32.xlu1 %v469_v45, %s730_s27  ;;  %550 = vrot.lane.b32.xlu2 %v469_v45, %s731_s28 }
 0x13e   : > { %552 = vrot.lane.b32.xlu0 %v470_v46, %s731_s28 }
 0x140   : > { %v454_v47 = vpop.f32.mrf.mxu0  ;;  %v467_v48 = vpop.f32.mrf.mxu1 }
 0x145   : > { %541 = vrot.lane.b32.xlu1 %v470_v46, %s732_s29  ;;  %530 = vrot.lane.b32.xlu2 %v470_v46, %s730_s27 }
 0x146   : > { %539 = vrot.lane.b32.xlu0 %v469_v45, %s732_s29 }
 0x14d   : > { %495 = vrot.lane.b32.xlu1 %v470_v46, %s734_s7  ;;  %517 = vrot.lane.b32.xlu2 %v469_v45, %s733_s30 }
 0x14e   : > { %519 = vrot.lane.b32.xlu0 %v470_v46, %s733_s30 }
 0x155   : > { %509 = vrot.lane.b32.xlu1 %v469_v45, %s735_s8  ;;  %498 = vrot.lane.b32.xlu2 %v469_v45, %s734_s7  ;;  %s701_s7 = sshll.u32 %s1019_s22, 4 }
 0x156   : > { %506 = vrot.lane.b32.xlu0 %v470_v46, %s735_s8 }
 0x15d   : > { %484 = vrot.lane.b32.xlu1 %v470_v46, %s737_s10  ;;  %472 = vrot.lane.b32.xlu2 %v470_v46, %s736_s9 }
 0x15e   : > { %476 = vrot.lane.b32.xlu0 %v469_v45, %s736_s9 }
 0x165   : > { %487 = vrot.lane.b32.xlu2 %v469_v45, %s737_s10  ;;  %s251_s10 = scalar_lea.vmem %s1017_s6, %s701_s7 }
 0x166   : > { %575 = vperm.xlu0 %721, %v572_v9  }
 0x197   : > { %v551_v50 = vpop.permute.xlu2 %550 }
 0x19f   : > { %v531_v52 = vpop.permute.xlu2 %530 }
 0x1a7   : > { %v518_v59 = vpop.permute.xlu2 %517 }
 0x1af   : > { %v529_v53 = vpop.permute.xlu1 %528  ;;  %v499_v27 = vpop.permute.xlu2 %498 }
 0x1b0   : > { %v553_v55 = vpop.permute.xlu0 %552  ;;  %v532_v4 = vsel %vm363_vm2, %v529_v53, %v531_v52  ;;  %v536_v5 = vsel %vm363_vm2, %v531_v52, %v529_v53 }
 0x1b1   : > { %v554_v60 = vsel %vm401_vm3, %v551_v50, %v553_v55  ;;  %v558_v61 = vsel %vm401_vm3, %v553_v55, %v551_v50  ;;  %v538_v22 = vmul.f32 %v536_v5, %v373_v17 }
 0x1b2   : > { %v559_v62 = vmul.f32 %v554_v60, %v410_v12  ;;  %v560_v63 = vmul.f32 %v558_v61, %v411_v13  ;;  %v537_v13 = vmul.f32 %v532_v4, %v372_v16 }
 0x1b4   : > { %v569_v0 = vpack.c.bf16 %v559_v62, %v559_v62  ;;  %v570_v1 = vpack.c.bf16 %v560_v63, %v560_v63 }
 0x1b6   : > { %v582_v2 = vsel %vm260_vm0, %v569_v0, 0  ;;  %v585_v3 = vsel %vm260_vm0, %v570_v1, 0 }
 0x1b7   : > { %590 = vmatpush.bf16.msra.mxu2 %v582_v2  ;;  %603 = vmatpush.bf16.msra.mxu3 %v585_v3  ;;  %v542_v6 = vpop.permute.xlu1 %541  ;;  %v473_v17 = vpop.permute.xlu2 %472 }
 0x1b8   : > { %v540_v7 = vpop.permute.xlu0 %539 }
 0x1b9   : > { %v543_v19 = vsel %vm382_vm1, %v540_v7, %v542_v6  ;;  %v547_v12 = vsel %vm382_vm1, %v542_v6, %v540_v7 }
 0x1ba   : > { %v548_v25 = vmul.f32 %v543_v19, %v391_v14  ;;  %v549_v26 = vmul.f32 %v547_v12, %v392_v15 }
 0x1bc   : > { %v567_v29 = vpack.c.bf16 %v548_v25, %v537_v13  ;;  %v568_v30 = vpack.c.bf16 %v549_v26, %v538_v22 }
 0x1be   : > { %591 = vmatpush.bf16.msra.mxu2 %v567_v29  ;;  %604 = vmatpush.bf16.msra.mxu3 %v568_v30 }
 0x1bf   : > { %v496_v31 = vpop.permute.xlu1 %495 }
 0x1c0   : > { %v520_v32 = vpop.permute.xlu0 %519  ;;  %v500_v34 = vsel %vm307_vm8, %v499_v27, %v496_v31  ;;  %v503_v35 = vsel %vm307_vm8, %v496_v31, %v499_v27 }
 0x1c1   : > { %v521_v33 = vsel %vm344_vm4, %v518_v59, %v520_v32  ;;  %v525_v16 = vsel %vm344_vm4, %v520_v32, %v518_v59  ;;  %v505_v28 = vmul.f32 %v500_v34, %v316_v58 }
 0x1c2   : > { %v526_v11 = vmul.f32 %v521_v33, %v353_v38  ;;  %v527_v14 = vmul.f32 %v525_v16, %v354_v39  ;;  %v504_v38 = vmul.f32 %v503_v35, %v315_v57 }
 0x1c4   : > { %v565_v10 = vpack.c.bf16 %v526_v11, %v469_v45  ;;  %v566_v15 = vpack.c.bf16 %v527_v14, %v470_v46  ;;  %v488_v45 = vpop.permute.xlu2 %487 }
 0x1c6   : > { %592 = vmatpush.bf16.msra.mxu2 %v565_v10  ;;  %605 = vmatpush.bf16.msra.mxu3 %v566_v15 }
 0x1c7   : > { %v510_v36 = vpop.permute.xlu1 %509 }
 0x1c8   : > { %v507_v37 = vpop.permute.xlu0 %506 }
 0x1c9   : > { %v511_v40 = vsel %vm326_vm7, %v510_v36, %v507_v37  ;;  %v514_v41 = vsel %vm326_vm7, %v507_v37, %v510_v36 }
 0x1ca   : > { %v515_v39 = vmul.f32 %v514_v41, %v334_v54  ;;  %v516_v42 = vmul.f32 %v511_v40, %v335_v56 }
 0x1cc   : > { %v563_v43 = vpack.c.bf16 %v515_v39, %v504_v38  ;;  %v564_v44 = vpack.c.bf16 %v516_v42, %v505_v28 }
 0x1ce   : > { %593 = vmatpush.bf16.msra.mxu2 %v563_v43  ;;  %606 = vmatpush.bf16.msra.mxu3 %v564_v44 }
 0x1cf   : > { %v485_v46 = vpop.permute.xlu1 %484 }
 0x1d0   : > { %v489_v47 = vsel %vm288_vm10, %v488_v45, %v485_v46  ;;  %v492_v48 = vsel %vm288_vm10, %v485_v46, %v488_v45  ;;  %v477_v57 = vpop.permute.xlu0 %476 }
 0x1d1   : > { %v493_v51 = vmul.f32 %v492_v48, %v296_v23  ;;  %v494_v54 = vmul.f32 %v489_v47, %v297_v24  ;;  %v478_v49 = vsel %vm270_vm9, %v477_v57, %v473_v17  ;;  %v481_v56 = vsel %vm270_vm9, %v473_v17, %v477_v57  ;;  %v571_v23 = vld [vmem:[%s1015_s4] sm:$0xf] }
 0x1d2   : > { %v482_v58 = vmul.f32 %v481_v56, %v277_v20  ;;  %v483_v50 = vmul.f32 %v478_v49, %v278_v21 }
 0x1d4   : > { %v561_v52 = vpack.c.bf16 %v493_v51, %v482_v58  ;;  %v562_v53 = vpack.c.bf16 %v494_v54, %v483_v50 }
 0x1d6   : > { %594 = vmatpush.bf16.msra.mxu2 %v561_v52  ;;  %607 = vmatpush.bf16.msra.mxu3 %v562_v53 }
 0x1d8   : > { %v576_v18 = vpop.permute.xlu0 %575 }
 0x1d9   : > { %696 = vmatmul.msk.bf16.vlgmr.msra.gmra.mxu2 %vm433_vm11, %v571_v23  ;;  %697 = vmatmul.msk.bf16.vlgmr.msra.gmra.mxu3 %vm433_vm11, %v571_v23 }
 0x25c   : > { %v596_v24 = vpop.f32.mrf.mxu2  ;;  %v609_v55 = vpop.f32.mrf.mxu3 }
 0x25d   : > { %v597_v20 = vadd.f32 %v596_v24, %v576_v18  ;;  %v610_v59 = vadd.f32 %v609_v55, %v576_v18 }
 0x25f   : > { %v613_v8 = vmax.f32 %v597_v20, 0.0  ;;  %v614_v21 = vmax.f32 %v610_v59, 0.0 }
 0x261   : > { %615 = vst [vmem:[%s251_s10] sm:$0xff] %v613_v8 }
 0x262   : > { %616 = vst [vmem:[%s251_s10 + $0x8] sm:$0xff] %v614_v21 }
 0x264   : > { %v598_v60 = vpop.f32.mrf.mxu2  ;;  %v611_v61 = vpop.f32.mrf.mxu3 }
 0x265 PF: > { %s16_s21 = sadd.s32 1, %s728_s21  }
 0x266   : > { %p13_p4 = scmp.ge.s32.totalorder %s16_s21, 4  }
 0x268   :  { %15 = sbr.rel (!%p13_p4) target bundleno = 1 (0x1), region = 81 }

</bundles_post_ra>
